<compile_context>
chip_gen: v6e
topology: v6e:2x2x1
jax: 0.10.0
libtpu: 0.0.40
codegen_flags: <defaults>
</compile_context>

<pallas_src>
import functools

import jax
import jax.numpy as jnp
from jax.experimental import pallas as pl
from jax.experimental.pallas import tpu as pltpu


def _contrastive_loss_kernel(a_ref, b_ref, s_ref, out_ref, denom_ref, *,
                             inv_temp, total_m):
    j = pl.program_id(1)

    a = a_ref[...]          # [TM, K] row tile, already L2-normalized, f32
    b = b_ref[...]          # [TN, K] column tile, already L2-normalized, f32

    # [TM, TN] similarity slab on the MXU, scaled by 1/temperature.
    sim = jnp.dot(a, b.T, preferred_element_type=jnp.float32) * inv_temp

    @pl.when(j == 0)
    def _():
        denom_ref[...] = jnp.zeros_like(denom_ref)

    # Flash-style accumulation of the softmax denominator over column tiles.
    # exp -> EUP, cross-lane sum -> XLU: both off the VALU/MXU critical path.
    # TODO(synk): no max-subtraction (matches the reference exactly); exp can
    # overflow f32 for temperature <~ 0.012.
    denom_ref[...] += jnp.sum(jnp.exp(sim), axis=1, keepdims=True)

    @pl.when(j == pl.num_programs(1) - 1)
    def _():
        # Remove the diagonal term exp(sim_ii) (fill_diagonal_(0) in the reference);
        # sim_ii = |fn_i|^2 / T, computed exactly from the row tile.
        self_sim = inv_temp * jnp.sum(a * a, axis=1, keepdims=True)   # [TM, 1]
        denom = denom_ref[...] - jnp.exp(self_sim)
        # sum_j sim_ij via matvec with s = sum_j fn_j (avoids re-reducing slabs).
        row_sim_sum = inv_temp * jnp.dot(a, s_ref[...].T,
                                         preferred_element_type=jnp.float32)  # [TM, 1]
        # Per-row contribution to sum_{i,j} -(sim_ij - log(denom_i)):
        #   M * log(denom_i) - sum_j sim_ij
        out_ref[...] = total_m * jnp.log(denom) - row_sim_sum


def contrastive_loss(features, labels=None, ious=None, *, temperature=0.2,
                     tm=128, tn=512):
    """Pallas implementation of ContrastiveLoss.forward.

    labels/ious are unused by the reference forward's returned value (the
    `loss = -log_prob` overwrite), see module-level note.
    """
    del labels, ious  # dead in the reference forward
    m, k = features.shape
    tm = min(tm, m)
    tn = min(tn, m)
    assert m % tm == 0 and m % tn == 0, "M must be a multiple of the tiles"

    # One-time L2 normalization (rsqrt) and column sum, outside the grid loop.
    f = features.astype(jnp.float32)
    fn = f * jax.lax.rsqrt(jnp.sum(f * f, axis=1, keepdims=True))
    s = jnp.sum(fn, axis=0, keepdims=True)             # [1, K]

    kernel = functools.partial(
        _contrastive_loss_kernel,
        inv_temp=float(1.0 / temperature),             # Python floats only: no
        total_m=float(m),                              # captured jaxpr constants
    )

    per_row = pl.pallas_call(
        kernel,
        out_shape=jax.ShapeDtypeStruct((m, 1), jnp.float32),
        grid_spec=pltpu.PrefetchScalarGridSpec(
            num_scalar_prefetch=0,
            grid=(m // tm, m // tn),                   # reduction (cols) axis last
            in_specs=[
                pl.BlockSpec((tm, k), lambda i, j: (i, 0)),   # row tile (resident across j)
                pl.BlockSpec((tn, k), lambda i, j: (j, 0)),   # column tile
                pl.BlockSpec((1, k), lambda i, j: (0, 0)),    # s = sum of normalized rows
            ],
            out_specs=pl.BlockSpec((tm, 1), lambda i, j: (i, 0)),
            scratch_shapes=[pltpu.VMEM((tm, 1), jnp.float32)],  # denominator accumulator
        ),
        compiler_params=pltpu.CompilerParams(
            dimension_semantics=("parallel", "arbitrary"),
        ),
    )(fn, fn, s)

    # Tiny final reduce in the wrapper: loss = mean over M^2 entries.
    return jnp.sum(per_row) / float(m * m)


def _reference_loss(features, temperature=0.2):
    f = features.astype(jnp.float32)
    fn = f / jnp.linalg.norm(f, axis=1, keepdims=True)
    sim = (fn @ fn.T) / temperature
    m = sim.shape[0]
    logits_mask = 1.0 - jnp.eye(m, dtype=jnp.float32)
    denom = jnp.sum(jnp.exp(sim) * logits_mask, axis=1, keepdims=True)
    log_prob = sim - jnp.log(denom)
    return jnp.mean(-log_prob)


if __name__ == "__main__":
    key = jax.random.PRNGKey(0)
    k_feat, k_lab, k_iou = jax.random.split(key, 3)

    M, K = 256, 32
    features = jax.random.normal(k_feat, (M, K), dtype=jnp.float32)
    labels = jax.random.randint(k_lab, (M,), 0, 5, dtype=jnp.int32)
    ious = jax.random.uniform(k_iou, (M,), dtype=jnp.float32)

    loss = contrastive_loss(features, labels, ious, temperature=0.2)
    loss = jax.block_until_ready(loss)

    ref = _reference_loss(features, temperature=0.2)
    assert jnp.allclose(loss, ref, rtol=1e-5, atol=1e-5), (loss, ref)

    print("KERNEL_OK")
</pallas_src>

<mosaic_0001>
module attributes {stable_mosaic.version = 11 : i64} {
  func.func @_contrastive_loss_kernel(%arg0: i32, %arg1: i32, %arg2: memref<128x32xf32, #tpu.memory_space<vmem>>, %arg3: memref<256x32xf32, #tpu.memory_space<vmem>>, %arg4: memref<1x32xf32, #tpu.memory_space<vmem>>, %arg5: memref<128x1xf32, #tpu.memory_space<vmem>>, %arg6: memref<128x1xf32, #tpu.memory_space<vmem>>) attributes {dimension_semantics = [#tpu.dimension_semantics<parallel>, #tpu.dimension_semantics<arbitrary>], iteration_bounds = array<i64: 2, 1>, scalar_prefetch = 0 : i64, scratch_operands = 1 : i64, tpu.core_type = #tpu.core_type<tc>, window_params = [{transform_indices = @transform_0, window_bounds = array<i64: 128, 32>}, {transform_indices = @transform_1, window_bounds = array<i64: 256, 32>}, {pipeline_mode = #tpu.pipeline_mode<synchronous>, transform_indices = @transform_2, window_bounds = array<i64: 1, 32>}, {transform_indices = @transform_3, window_bounds = array<i64: 128, 1>}]} {
    %c0 = arith.constant 0 : index
    %c0_0 = arith.constant 0 : index
    %0 = vector.load %arg2[%c0, %c0_0] : memref<128x32xf32, #tpu.memory_space<vmem>>, vector<128x32xf32>
    %c0_1 = arith.constant 0 : index
    %c0_2 = arith.constant 0 : index
    %1 = vector.load %arg3[%c0_1, %c0_2] : memref<256x32xf32, #tpu.memory_space<vmem>>, vector<256x32xf32>
    %2 = tpu.transpose %1, [1, 0] : vector<256x32xf32> -> vector<32x256xf32>
    %cst = arith.constant dense<0.000000e+00> : vector<128x256xf32>
    %3 = tpu.matmul %0, %2, %cst {dimension_numbers = #tpu.dot_dimension_numbers<[1], [0], [0], [1], [0, 0, 1, 1], [], []>} : vector<128x32xf32>, vector<32x256xf32>, vector<128x256xf32> -> vector<128x256xf32>
    %cst_3 = arith.constant 5.000000e+00 : f32
    %4 = vector.broadcast %cst_3 : f32 to vector<128x256xf32>
    %5 = arith.mulf %3, %4 : vector<128x256xf32>
    %c0_i32 = arith.constant 0 : i32
    %6 = arith.cmpi eq, %arg1, %c0_i32 : i32
    %7 = arith.extui %6 : i1 to i32
    %c0_i32_4 = arith.constant 0 : i32
    %8 = arith.cmpi ne, %7, %c0_i32_4 : i32
    scf.if %8 {
      %cst_12 = arith.constant 0.000000e+00 : f32
      %18 = vector.broadcast %cst_12 : f32 to vector<128x1xf32>
      %c0_13 = arith.constant 0 : index
      %c0_14 = arith.constant 0 : index
      %19 = vector.load %arg6[%c0_13, %c0_14] : memref<128x1xf32, #tpu.memory_space<vmem>>, vector<128x1xf32>
      tpu.vector_store %arg6[%c0_13, %c0_14], %18 {strides = array<i32>} : memref<128x1xf32, #tpu.memory_space<vmem>>, vector<128x1xf32>,
    } else {
    }
    %c0_5 = arith.constant 0 : index
    %c0_6 = arith.constant 0 : index
    %9 = vector.load %arg6[%c0_5, %c0_6] : memref<128x1xf32, #tpu.memory_space<vmem>>, vector<128x1xf32>
    %10 = math.exp %5 : vector<128x256xf32>
    %cst_7 = arith.constant dense<0.000000e+00> : vector<128xf32>
    %11 = vector.multi_reduction <add>, %10, %cst_7 [1] : vector<128x256xf32> to vector<128xf32>
    %12 = vector.shape_cast %11 : vector<128xf32> to vector<128x1xf32>
    %13 = arith.addf %9, %12 : vector<128x1xf32>
    %c0_8 = arith.constant 0 : index
    %c0_9 = arith.constant 0 : index
    %14 = vector.load %arg6[%c0_8, %c0_9] : memref<128x1xf32, #tpu.memory_space<vmem>>, vector<128x1xf32>
    tpu.vector_store %arg6[%c0_8, %c0_9], %13 {strides = array<i32>} : memref<128x1xf32, #tpu.memory_space<vmem>>, vector<128x1xf32>,
    %c0_i32_10 = arith.constant 0 : i32
    %15 = arith.cmpi eq, %arg1, %c0_i32_10 : i32
    %16 = arith.extui %15 : i1 to i32
    %c0_i32_11 = arith.constant 0 : i32
    %17 = arith.cmpi ne, %16, %c0_i32_11 : i32
    scf.if %17 {
      %18 = arith.mulf %0, %0 : vector<128x32xf32>
      %cst_12 = arith.constant dense<0.000000e+00> : vector<128xf32>
      %19 = vector.multi_reduction <add>, %18, %cst_12 [1] : vector<128x32xf32> to vector<128xf32>
      %20 = vector.shape_cast %19 : vector<128xf32> to vector<128x1xf32>
      %cst_13 = arith.constant 5.000000e+00 : f32
      %21 = vector.broadcast %cst_13 : f32 to vector<128x1xf32>
      %22 = arith.mulf %21, %20 : vector<128x1xf32>
      %c0_14 = arith.constant 0 : index
      %c0_15 = arith.constant 0 : index
      %23 = vector.load %arg6[%c0_14, %c0_15] : memref<128x1xf32, #tpu.memory_space<vmem>>, vector<128x1xf32>
      %24 = math.exp %22 : vector<128x1xf32>
      %25 = arith.subf %23, %24 : vector<128x1xf32>
      %c0_16 = arith.constant 0 : index
      %c0_17 = arith.constant 0 : index
      %26 = vector.load %arg4[%c0_16, %c0_17] : memref<1x32xf32, #tpu.memory_space<vmem>>, vector<1x32xf32>
      %27 = tpu.transpose %26, [1, 0] : vector<1x32xf32> -> vector<32x1xf32>
      %cst_18 = arith.constant dense<0.000000e+00> : vector<128x1xf32>
      %28 = tpu.matmul %0, %27, %cst_18 {dimension_numbers = #tpu.dot_dimension_numbers<[1], [0], [0], [1], [0, 0, 1, 1], [], []>} : vector<128x32xf32>, vector<32x1xf32>, vector<128x1xf32> -> vector<128x1xf32>
      %cst_19 = arith.constant 5.000000e+00 : f32
      %29 = vector.broadcast %cst_19 : f32 to vector<128x1xf32>
      %30 = arith.mulf %29, %28 : vector<128x1xf32>
      %31 = math.log %25 : vector<128x1xf32>
      %cst_20 = arith.constant 2.560000e+02 : f32
      %32 = vector.broadcast %cst_20 : f32 to vector<128x1xf32>
      %33 = arith.mulf %32, %31 : vector<128x1xf32>
      %34 = arith.subf %33, %30 : vector<128x1xf32>
      %c0_21 = arith.constant 0 : index
      %c0_22 = arith.constant 0 : index
      %35 = vector.load %arg5[%c0_21, %c0_22] : memref<128x1xf32, #tpu.memory_space<vmem>>, vector<128x1xf32>
      tpu.vector_store %arg5[%c0_21, %c0_22], %34 {strides = array<i32>} : memref<128x1xf32, #tpu.memory_space<vmem>>, vector<128x1xf32>,
    } else {
    }
    return
  }
  func.func @transform_0(%arg0: i32, %arg1: i32) -> (i32, i32) {
    %c0_i32 = arith.constant 0 : i32
    %c0_i32_0 = arith.constant 0 : i32
    return %arg0, %c0_i32 : i32, i32
  }
  func.func @transform_1(%arg0: i32, %arg1: i32) -> (i32, i32) {
    %c0_i32 = arith.constant 0 : i32
    %c0_i32_0 = arith.constant 0 : i32
    return %arg1, %c0_i32 : i32, i32
  }
  func.func @transform_2(%arg0: i32, %arg1: i32) -> (i32, i32) {
    %c0_i32 = arith.constant 0 : i32
    %c0_i32_0 = arith.constant 0 : i32
    %c0_i32_1 = arith.constant 0 : i32
    return %c0_i32, %c0_i32_0 : i32, i32
  }
  func.func @transform_3(%arg0: i32, %arg1: i32) -> (i32, i32) {
    %c0_i32 = arith.constant 0 : i32
    %c0_i32_0 = arith.constant 0 : i32
    return %arg0, %c0_i32 : i32, i32
  }
}

</mosaic_0001>

<bundles_post_ra>
// kernel: tpu_custom_call.1
= control target key start
LH: loop header
LB: loop body
LE: loop exit
PB: predicated region body
PF: predicated region fallthrough
CT: control target
= control target key end

     0   :  { %s1525_s12 = smov 0   ;;  %s1527_s13 = smov 0   ;;  %s2021_s0 = inlined_call_operand.vmem [shape: f32[256,32], index: 0, kind: input, shape index: {}]   ;;  %s2022_s1 = inlined_call_operand.vmem [shape: f32[256,32], index: 1, kind: input, shape index: {}]   ;;  %s2023_s2 = inlined_call_operand.vmem [shape: f32[1,32], index: 2, kind: input, shape index: {}]   ;;  %s2024_s3 = inlined_call_operand.vmem [shape: f32[256,1], index: 3, kind: output, shape index: {}]  }
   0x1   :  { %s1529_s14 = smov 0  }
   0x2 LB: > { %s25_s15 = sadd.s32 1, %s1498_s13  ;;  %p1175_p0 = scmp.ge.s32.totalorder %s1502_s14, 1  ;;  %s1502_s14 = sphi %s1529_s14, %s13_s14   ;;  %s1498_s13 = sphi %s1527_s13, %s2026_s13   ;;  %s1494_s12 = sphi %s1525_s12, %s2025_s12  }
   0x3   : > { %p27_p1 = scmp.ge.s32.totalorder %s25_s15, 2  ;;  %p161_p2 = scmp.lt.s32.totalorder %s1502_s14, 3 }
   0x5   : > { %s2028_s15 = smov (%p27_p1, %s25_s15), 0  ;;  %p162_p3 = pnand %p1175_p0, %p161_p2 }
   0x6   : > { %s1176_s22 = sshll.u32 (!%p162_p3), %s1494_s12, 4 }
   0x7   : > { %165 = sbr.rel (%p162_p3) target bundleno = 495 (0x1ef), region = 32  ;;  %p191_p4 = scmp.lt.s32.totalorder (!%p162_p3), %s1176_s22, 31 }
   0xc   : > { %v255_v0 = vld [vmem:[%s2022_s1 + $0xf8] sm:$0xff]  ;;  %vm256_vm0 = vcmask 261120   ;;  %v254_v2 = vld [vmem:[%s2022_s1 + $0xf0] sm:$0xff]  ;;  %s2030_s22 = smov (!%p191_p4, %s1176_s22), 31  ;;  %v253_v4 = vld [vmem:[%s2022_s1 + $0xe8] sm:$0xff]  ;;  %vm598_vm1 = vcmask 7168  }
   0xd   : > { %v239_v1 = vld [vmem:[%s2022_s1 + $0x78] sm:$0xff]  ;;  %1231 = vmatprep.subr.msk.mxu0 %vm256_vm0, %v255_v0  ;;  %1295 = vmatprep.subr.msk.mxu1 %vm256_vm0, %v255_v0  ;;  %v238_v3 = vld [vmem:[%s2022_s1 + $0x70] sm:$0xff]  ;;  %s1177_s27 = sshll.u32 %s2030_s22, 3  ;;  %v237_v5 = vld [vmem:[%s2022_s1 + $0x68] sm:$0xff] }
   0xe   : > { %1232 = vmatpush3.xpose.msk.msra.mxu0 %vm256_vm0, %v239_v1  ;;  %1311 = vmatpush3.xpose.msk.msra.mxu1 %vm256_vm0, %v239_v1  ;;  %s1579_s5 = scalar_lea.vmem %s2021_s0, %s1177_s27  ;;  %v252_v6 = vld [vmem:[%s2022_s1 + $0xe0] sm:$0xff]  ;;  %v251_v9 = vld [vmem:[%s2022_s1 + $0xd8] sm:$0xff]  ;;  %v250_v21 = vld [vmem:[%s2022_s1 + $0xd0] sm:$0xff]  ;;  %s1974_s23 = scalar_lea.vmem %s2024_s3, %s1177_s27 }
   0xf   : > { %1233 = vmatprep.subr.msk.mxu0 %vm256_vm0, %v254_v2  ;;  %1296 = vmatprep.subr.msk.mxu1 %vm256_vm0, %v254_v2  ;;  %v1587_v7 = vld [vmem:[%s1579_s5] sm:$0xff]  ;;  %v1607_v12 = vld [vmem:[%s1579_s5 + $0x8] sm:$0xff]  ;;  %v1610_v13 = vld [vmem:[%s1579_s5 + $0x10] sm:$0xff] }
  0x10   : > { %v236_v8 = vld [vmem:[%s2022_s1 + $0x60] sm:$0xff]  ;;  %v779_v11 = vmul.f32 %v1587_v7, %v1587_v7  ;;  %1263 = vmatprep.mubr.msk.f32.mxu0 %vm256_vm0, %v1587_v7  ;;  %v1613_v14 = vld [vmem:[%s1579_s5 + $0x18] sm:$0xff]  ;;  %v781_v16 = vmul.f32 %v1610_v13, %v1610_v13  ;;  %v780_v17 = vmul.f32 %v1607_v12, %v1607_v12  ;;  %v1637_v23 = vld [vmem:[%s1579_s5 + $0x28] sm:$0xff] }
  0x11   : > { %v1598_v10 = vld [vmem:[%s1579_s5 + $0x40] sm:$0xff]  ;;  %v782_v18 = vmul.f32 %v1613_v14, %v1613_v14  ;;  %v235_v19 = vld [vmem:[%s2022_s1 + $0x58] sm:$0xff]  ;;  %v784_v27 = vmul.f32 %v1637_v23, %v1637_v23  ;;  %v234_v28 = vld [vmem:[%s2022_s1 + $0x50] sm:$0xff] }
  0x12   : > { %1234 = vmatpush3.xpose.msk.msra.mxu0 %vm256_vm0, %v238_v3  ;;  %1312 = vmatpush3.xpose.msk.msra.mxu1 %vm256_vm0, %v238_v3  ;;  %v795_v15 = vsel %vm256_vm0, %v779_v11, 0.0  ;;  %v801_v20 = vsel %vm256_vm0, %v781_v16, 0.0  ;;  %v1634_v22 = vld [vmem:[%s1579_s5 + $0x20] sm:$0xff]  ;;  %v798_v24 = vsel %vm256_vm0, %v780_v17, 0.0  ;;  %v249_v29 = vld [vmem:[%s2022_s1 + $0xc8] sm:$0xff]  ;;  %v1656_v30 = vld [vmem:[%s1579_s5 + $0x30] sm:$0xff]  ;;  %v787_v63 = vmul.f32 %v1598_v10, %v1598_v10 }
  0x13   : > { %1235 = vmatprep.subr.msk.mxu0 %vm256_vm0, %v253_v4  ;;  %1297 = vmatprep.subr.msk.mxu1 %vm256_vm0, %v253_v4  ;;  %v804_v25 = vsel %vm256_vm0, %v782_v18, 0.0  ;;  %v783_v26 = vmul.f32 %v1634_v22, %v1634_v22  ;;  %v810_v32 = vsel %vm256_vm0, %v784_v27, 0.0  ;;  %v785_v33 = vmul.f32 %v1656_v30, %v1656_v30  ;;  %v233_v34 = vld [vmem:[%s2022_s1 + $0x48] sm:$0xff]  ;;  %v248_v35 = vld [vmem:[%s2022_s1 + $0xc0] sm:$0xff]  ;;  %v247_v38 = vld [vmem:[%s2022_s1 + $0xb8] sm:$0xff] }
  0x14   : > { %1279 = vmatprep.mubr.msk.f32.mxu1 %vm256_vm0, %v1598_v10  ;;  %796 = vadd.xlane.f32.xlu0 %v795_v15  ;;  %v232_v37 = vld [vmem:[%s2022_s1 + $0x40] sm:$0xff]  ;;  %v231_v39 = vld [vmem:[%s2022_s1 + $0x38] sm:$0xff]  ;;  %v246_v40 = vld [vmem:[%s2022_s1 + $0xb0] sm:$0xff]  ;;  %v819_v1 = vsel %vm256_vm0, %v787_v63, 0.0 }
  0x15   : > { %802 = vadd.xlane.f32.xlu1 %v801_v20  ;;  %v807_v31 = vsel %vm256_vm0, %v783_v26, 0.0  ;;  %v813_v36 = vsel %vm256_vm0, %v785_v33, 0.0  ;;  %v230_v41 = vld [vmem:[%s2022_s1 + $0x30] sm:$0xff]  ;;  %v245_v42 = vld [vmem:[%s2022_s1 + $0xa8] sm:$0xff]  ;;  %v244_v44 = vld [vmem:[%s2022_s1 + $0xa0] sm:$0xff] }
  0x16   : > { %1236 = vmatpush3.xpose.msk.msra.mxu0 %vm256_vm0, %v237_v5  ;;  %1313 = vmatpush3.xpose.msk.msra.mxu1 %vm256_vm0, %v237_v5  ;;  %v229_v43 = vld [vmem:[%s2022_s1 + $0x28] sm:$0xff]  ;;  %v228_v45 = vld [vmem:[%s2022_s1 + $0x20] sm:$0xff]  ;;  %v243_v46 = vld [vmem:[%s2022_s1 + $0x98] sm:$0xff] }
  0x17   : > { %1237 = vmatprep.subr.msk.mxu0 %vm256_vm0, %v252_v6  ;;  %1298 = vmatprep.subr.msk.mxu1 %vm256_vm0, %v252_v6  ;;  %v227_v47 = vld [vmem:[%s2022_s1 + $0x18] sm:$0xff]  ;;  %v242_v48 = vld [vmem:[%s2022_s1 + $0x90] sm:$0xff]  ;;  %v241_v50 = vld [vmem:[%s2022_s1 + $0x88] sm:$0xff] }
  0x18   : > { %799 = vadd.xlane.f32.xlu0 %v798_v24  ;;  %v226_v49 = vld [vmem:[%s2022_s1 + $0x10] sm:$0xff]  ;;  %v225_v51 = vld [vmem:[%s2022_s1 + $0x8] sm:$0xff]  ;;  %v240_v52 = vld [vmem:[%s2022_s1 + $0x80] sm:$0xff] }
  0x19   : > { %805 = vadd.xlane.f32.xlu1 %v804_v25  ;;  %v224_v53 = vld [vmem:[%s2022_s1] sm:$0xff]  ;;  %v1763_v54 = vld [vmem:[%s1579_s5 + $0x48] sm:$0xff]  ;;  %v1774_v55 = vld [vmem:[%s1579_s5 + $0x50] sm:$0xff] }
  0x1a   : > { %1238 = vmatpush3.xpose.msk.msra.mxu0 %vm256_vm0, %v236_v8  ;;  %1314 = vmatpush3.xpose.msk.msra.mxu1 %vm256_vm0, %v236_v8  ;;  %v1785_v56 = vld [vmem:[%s1579_s5 + $0x58] sm:$0xff]  ;;  %v1796_v57 = vld [vmem:[%s1579_s5 + $0x60] sm:$0xff]  ;;  %v1807_v58 = vld [vmem:[%s1579_s5 + $0x68] sm:$0xff]  ;;  %v788_v2 = vmul.f32 %v1763_v54, %v1763_v54  ;;  %v789_v3 = vmul.f32 %v1774_v55, %v1774_v55 }
  0x1b   : > { %1239 = vmatprep.subr.msk.mxu0 %vm256_vm0, %v251_v9  ;;  %1299 = vmatprep.subr.msk.mxu1 %vm256_vm0, %v251_v9  ;;  %v1818_v59 = vld [vmem:[%s1579_s5 + $0x70] sm:$0xff]  ;;  %v1829_v60 = vld [vmem:[%s1579_s5 + $0x38] sm:$0xff]  ;;  %v790_v6 = vmul.f32 %v1785_v56, %v1785_v56  ;;  %v791_v8 = vmul.f32 %v1796_v57, %v1796_v57  ;;  %v792_v15 = vmul.f32 %v1807_v58, %v1807_v58 }
  0x1c   : > { %808 = vadd.xlane.f32.xlu0 %v807_v31  ;;  %v1832_v61 = vld [vmem:[%s1579_s5 + $0x78] sm:$0xff]  ;;  %v786_v62 = vmul.f32 %v1829_v60, %v1829_v60  ;;  %v822_v4 = vsel %vm256_vm0, %v788_v2, 0.0  ;;  %v825_v5 = vsel %vm256_vm0, %v789_v3, 0.0  ;;  %v793_v16 = vmul.f32 %v1818_v59, %v1818_v59 }
  0x1d   : > { %811 = vadd.xlane.f32.xlu1 %v810_v32  ;;  %v828_v9 = vsel %vm256_vm0, %v790_v6, 0.0  ;;  %v831_v11 = vsel %vm256_vm0, %v791_v8, 0.0  ;;  %v834_v17 = vsel %vm256_vm0, %v792_v15, 0.0  ;;  %v794_v20 = vmul.f32 %v1832_v61, %v1832_v61 }
  0x1e   : > { %1240 = vmatpush3.xpose.msk.msra.mxu0 %vm256_vm0, %v235_v19  ;;  %1315 = vmatpush3.xpose.msk.msra.mxu1 %vm256_vm0, %v235_v19  ;;  %v816_v0 = vsel %vm256_vm0, %v786_v62, 0.0  ;;  %v837_v18 = vsel %vm256_vm0, %v793_v16, 0.0  ;;  %v1873_v19 = vld [vmem:[%s2023_s2] ss:$0 sm:$0xff] }
  0x1f   : > { %1241 = vmatprep.subr.msk.mxu0 %vm256_vm0, %v250_v21  ;;  %1300 = vmatprep.subr.msk.mxu1 %vm256_vm0, %v250_v21  ;;  %v930_v21 = vmul.f32 %v1873_v19, %v1587_v7  ;;  %v840_v24 = vsel %vm256_vm0, %v794_v20, 0.0  ;;  %v931_v26 = vmul.f32 %v1873_v19, %v1607_v12 }
  0x20   : > { %814 = vadd.xlane.f32.xlu0 %v813_v36 }
  0x21   : > { %817 = vadd.xlane.f32.xlu1 %v816_v0  ;;  %v946_v25 = vsel %vm256_vm0, %v930_v21, 0.0  ;;  %v949_v27 = vsel %vm256_vm0, %v931_v26, 0.0 }
  0x22   : > { %1242 = vmatpush3.xpose.msk.msra.mxu0 %vm256_vm0, %v234_v28  ;;  %1316 = vmatpush3.xpose.msk.msra.mxu1 %vm256_vm0, %v234_v28  ;;  %v1504_v28 = vmov 0.0  }
  0x23   : > { %1243 = vmatprep.subr.msk.mxu0 %vm256_vm0, %v249_v29  ;;  %1301 = vmatprep.subr.msk.mxu1 %vm256_vm0, %v249_v29  ;;  %599 = vst.msk [vmem:[#allocation2] sm:$0xff] %vm598_vm1, %v1504_v28  ;;  %600 = vst.msk [vmem:[#allocation2 + $0x8] sm:$0xff] %vm598_vm1, %v1504_v28 }
  0x24   : > { %820 = vadd.xlane.f32.xlu0 %v819_v1  ;;  %601 = vst.msk [vmem:[#allocation2 + $0x10] sm:$0xff] %vm598_vm1, %v1504_v28  ;;  %602 = vst.msk [vmem:[#allocation2 + $0x18] sm:$0xff] %vm598_vm1, %v1504_v28 }
  0x25   : > { %823 = vadd.xlane.f32.xlu1 %v822_v4  ;;  %603 = vst.msk [vmem:[#allocation2 + $0x20] sm:$0xff] %vm598_vm1, %v1504_v28  ;;  %604 = vst.msk [vmem:[#allocation2 + $0x28] sm:$0xff] %vm598_vm1, %v1504_v28 }
  0x26   : > { %1244 = vmatpush3.xpose.msk.msra.mxu0 %vm256_vm0, %v233_v34  ;;  %1317 = vmatpush3.xpose.msk.msra.mxu1 %vm256_vm0, %v233_v34  ;;  %605 = vst.msk [vmem:[#allocation2 + $0x30] sm:$0xff] %vm598_vm1, %v1504_v28  ;;  %606 = vst.msk [vmem:[#allocation2 + $0x38] sm:$0xff] %vm598_vm1, %v1504_v28 }
  0x27   : > { %1245 = vmatprep.subr.msk.mxu0 %vm256_vm0, %v248_v35  ;;  %1302 = vmatprep.subr.msk.mxu1 %vm256_vm0, %v248_v35  ;;  %607 = vst.msk [vmem:[#allocation2 + $0x40] sm:$0xff] %vm598_vm1, %v1504_v28  ;;  %608 = vst.msk [vmem:[#allocation2 + $0x48] sm:$0xff] %vm598_vm1, %v1504_v28 }
  0x28   : > { %826 = vadd.xlane.f32.xlu0 %v825_v5  ;;  %609 = vst.msk [vmem:[#allocation2 + $0x50] sm:$0xff] %vm598_vm1, %v1504_v28  ;;  %610 = vst.msk [vmem:[#allocation2 + $0x58] sm:$0xff] %vm598_vm1, %v1504_v28 }
  0x29   : > { %829 = vadd.xlane.f32.xlu1 %v828_v9  ;;  %611 = vst.msk [vmem:[#allocation2 + $0x60] sm:$0xff] %vm598_vm1, %v1504_v28  ;;  %612 = vst.msk [vmem:[#allocation2 + $0x68] sm:$0xff] %vm598_vm1, %v1504_v28 }
  0x2a   : > { %1246 = vmatpush3.xpose.msk.msra.mxu0 %vm256_vm0, %v232_v37  ;;  %1318 = vmatpush3.xpose.msk.msra.mxu1 %vm256_vm0, %v232_v37  ;;  %613 = vst.msk [vmem:[#allocation2 + $0x70] sm:$0xff] %vm598_vm1, %v1504_v28  ;;  %614 = vst.msk [vmem:[#allocation2 + $0x78] sm:$0xff] %vm598_vm1, %v1504_v28 }
  0x2b   : > { %1247 = vmatprep.subr.msk.mxu0 %vm256_vm0, %v247_v38  ;;  %1303 = vmatprep.subr.msk.mxu1 %vm256_vm0, %v247_v38 }
  0x2c   : > { %832 = vadd.xlane.f32.xlu0 %v831_v11 }
  0x2d   : > { %835 = vadd.xlane.f32.xlu1 %v834_v17 }
  0x2e   : > { %1248 = vmatpush3.xpose.msk.msra.mxu0 %vm256_vm0, %v231_v39  ;;  %1319 = vmatpush3.xpose.msk.msra.mxu1 %vm256_vm0, %v231_v39 }
  0x2f   : > { %1249 = vmatprep.subr.msk.mxu0 %vm256_vm0, %v246_v40  ;;  %1304 = vmatprep.subr.msk.mxu1 %vm256_vm0, %v246_v40 }
  0x30   : > { %838 = vadd.xlane.f32.xlu0 %v837_v18 }
  0x31   : > { %841 = vadd.xlane.f32.xlu1 %v840_v24 }
  0x32   : > { %1250 = vmatpush3.xpose.msk.msra.mxu0 %vm256_vm0, %v230_v41  ;;  %1320 = vmatpush3.xpose.msk.msra.mxu1 %vm256_vm0, %v230_v41 }
  0x33   : > { %1251 = vmatprep.subr.msk.mxu0 %vm256_vm0, %v245_v42  ;;  %1305 = vmatprep.subr.msk.mxu1 %vm256_vm0, %v245_v42 }
  0x34   : > { %947 = vadd.xlane.f32.xlu0 %v946_v25 }
  0x35   : > { %950 = vadd.xlane.f32.xlu1 %v949_v27 }
  0x36   : > { %1252 = vmatpush3.xpose.msk.msra.mxu0 %vm256_vm0, %v229_v43  ;;  %1321 = vmatpush3.xpose.msk.msra.mxu1 %vm256_vm0, %v229_v43 }
  0x37   : > { %1253 = vmatprep.subr.msk.mxu0 %vm256_vm0, %v244_v44  ;;  %1306 = vmatprep.subr.msk.mxu1 %vm256_vm0, %v244_v44 }
  0x3a   : > { %1254 = vmatpush3.xpose.msk.msra.mxu0 %vm256_vm0, %v228_v45  ;;  %1322 = vmatpush3.xpose.msk.msra.mxu1 %vm256_vm0, %v228_v45 }
  0x3b   : > { %1255 = vmatprep.subr.msk.mxu0 %vm256_vm0, %v243_v46  ;;  %1307 = vmatprep.subr.msk.mxu1 %vm256_vm0, %v243_v46 }
  0x3e   : > { %1256 = vmatpush3.xpose.msk.msra.mxu0 %vm256_vm0, %v227_v47  ;;  %1323 = vmatpush3.xpose.msk.msra.mxu1 %vm256_vm0, %v227_v47 }
  0x3f   : > { %1257 = vmatprep.subr.msk.mxu0 %vm256_vm0, %v242_v48  ;;  %1308 = vmatprep.subr.msk.mxu1 %vm256_vm0, %v242_v48 }
  0x42   : > { %1258 = vmatpush3.xpose.msk.msra.mxu0 %vm256_vm0, %v226_v49  ;;  %1324 = vmatpush3.xpose.msk.msra.mxu1 %vm256_vm0, %v226_v49 }
  0x43   : > { %1259 = vmatprep.subr.msk.mxu0 %vm256_vm0, %v241_v50  ;;  %1309 = vmatprep.subr.msk.mxu1 %vm256_vm0, %v241_v50 }
  0x46   : > { %1260 = vmatpush3.xpose.msk.msra.mxu0 %vm256_vm0, %v225_v51  ;;  %1325 = vmatpush3.xpose.msk.msra.mxu1 %vm256_vm0, %v225_v51 }
  0x47   : > { %1261 = vmatprep.subr.msk.mxu0 %vm256_vm0, %v240_v52  ;;  %1310 = vmatprep.subr.msk.mxu1 %vm256_vm0, %v240_v52 }
  0x4a   : > { %1262 = vmatpush3.xpose.msk.msra.mxu0 %vm256_vm0, %v224_v53  ;;  %1326 = vmatpush3.xpose.msk.msra.mxu1 %vm256_vm0, %v224_v53 }
  0x4d   : > { %1264 = vmatmul.mubr.msk.f32.vlgmr.msra.gmra.mxu0 %vm256_vm0, %v1587_v7  ;;  %1280 = vmatmul.mubr.msk.f32.vlgmr.msra.gmra.mxu1 %vm256_vm0, %v1598_v10 }
  0x4e   : > { %1265 = vmatprep.mubr.msk.f32.mxu0 %vm256_vm0, %v1607_v12  ;;  %1281 = vmatprep.mubr.msk.f32.mxu1 %vm256_vm0, %v1763_v54 }
  0x51   : > { %1266 = vmatmul.mubr.msk.f32.gmra.mxu0 %vm256_vm0, %v1607_v12  ;;  %1282 = vmatmul.mubr.msk.f32.gmra.mxu1 %vm256_vm0, %v1763_v54 }
  0x52   : > { %1267 = vmatprep.mubr.msk.f32.mxu0 %vm256_vm0, %v1610_v13  ;;  %1283 = vmatprep.mubr.msk.f32.mxu1 %vm256_vm0, %v1774_v55 }
  0x55   : > { %1268 = vmatmul.mubr.msk.f32.gmra.mxu0 %vm256_vm0, %v1610_v13  ;;  %1284 = vmatmul.mubr.msk.f32.gmra.mxu1 %vm256_vm0, %v1774_v55 }
  0x56   : > { %1269 = vmatprep.mubr.msk.f32.mxu0 %vm256_vm0, %v1613_v14  ;;  %1285 = vmatprep.mubr.msk.f32.mxu1 %vm256_vm0, %v1785_v56 }
  0x59   : > { %1270 = vmatmul.mubr.msk.f32.gmra.mxu0 %vm256_vm0, %v1613_v14  ;;  %1286 = vmatmul.mubr.msk.f32.gmra.mxu1 %vm256_vm0, %v1785_v56 }
  0x5a   : > { %1271 = vmatprep.mubr.msk.f32.mxu0 %vm256_vm0, %v1634_v22  ;;  %1287 = vmatprep.mubr.msk.f32.mxu1 %vm256_vm0, %v1796_v57 }
  0x5d   : > { %1272 = vmatmul.mubr.msk.f32.gmra.mxu0 %vm256_vm0, %v1634_v22  ;;  %1288 = vmatmul.mubr.msk.f32.gmra.mxu1 %vm256_vm0, %v1796_v57 }
  0x5e   : > { %1273 = vmatprep.mubr.msk.f32.mxu0 %vm256_vm0, %v1637_v23  ;;  %1289 = vmatprep.mubr.msk.f32.mxu1 %vm256_vm0, %v1807_v58 }
  0x61   : > { %1274 = vmatmul.mubr.msk.f32.gmra.mxu0 %vm256_vm0, %v1637_v23  ;;  %1290 = vmatmul.mubr.msk.f32.gmra.mxu1 %vm256_vm0, %v1807_v58 }
  0x62   : > { %1275 = vmatprep.mubr.msk.f32.mxu0 %vm256_vm0, %v1656_v30  ;;  %1291 = vmatprep.mubr.msk.f32.mxu1 %vm256_vm0, %v1818_v59 }
  0x65   : > { %1276 = vmatmul.mubr.msk.f32.gmra.mxu0 %vm256_vm0, %v1656_v30  ;;  %1292 = vmatmul.mubr.msk.f32.gmra.mxu1 %vm256_vm0, %v1818_v59 }
  0x66   : > { %1277 = vmatprep.mubr.msk.f32.mxu0 %vm256_vm0, %v1829_v60  ;;  %1293 = vmatprep.mubr.msk.f32.mxu1 %vm256_vm0, %v1832_v61 }
  0x69   : > { %1278 = vmatmul.mubr.msk.f32.gmra.mxu0 %vm256_vm0, %v1829_v60  ;;  %1294 = vmatmul.mubr.msk.f32.gmra.mxu1 %vm256_vm0, %v1832_v61 }
 0x10d   : > { %v467_v7 = vpop.f32.mrf.mxu0  ;;  %v515_v12 = vpop.f32.mrf.mxu1 }
 0x10e   : > { %v562_v29 = vmul.f32 5.0, %v467_v7  ;;  %v578_v31 = vmul.f32 5.0, %v515_v12 }
 0x10f   : > { %v469_v32 = vpop.f32.mrf.mxu0  ;;  %v517_v33 = vpop.f32.mrf.mxu1 }
 0x110   : > { %v631_v34 = vmul.f32 1.442695, %v562_v29  ;;  %v563_v35 = vmul.f32 5.0, %v469_v32  ;;  %v579_v36 = vmul.f32 5.0, %v517_v33  ;;  %v663_v37 = vmul.f32 1.442695, %v578_v31 }
 0x111   : > { %v473_v38 = vpop.f32.mrf.mxu0  ;;  %v521_v39 = vpop.f32.mrf.mxu1 }
 0x112   : > { %v633_v40 = vmul.f32 1.442695, %v563_v35  ;;  %v564_v41 = vmul.f32 5.0, %v473_v38  ;;  %v665_v42 = vmul.f32 1.442695, %v579_v36  ;;  %1352 = vpow2.f32 %v631_v34 }
 0x113   : > { %v475_v43 = vpop.f32.mrf.mxu0  ;;  %v580_v44 = vmul.f32 5.0, %v521_v39  ;;  %v523_v45 = vpop.f32.mrf.mxu1 }
 0x114   : > { %1354 = vpow2.f32 %v633_v40  ;;  %v635_v46 = vmul.f32 1.442695, %v564_v41  ;;  %v565_v47 = vmul.f32 5.0, %v475_v43  ;;  %v581_v48 = vmul.f32 5.0, %v523_v45 }
 0x115   : > { %1356 = vpow2.f32 %v663_v37  ;;  %v667_v49 = vmul.f32 1.442695, %v580_v44  ;;  %v479_v50 = vpop.f32.mrf.mxu0  ;;  %v527_v51 = vpop.f32.mrf.mxu1 }
 0x116   : > { %1358 = vpow2.f32 %v665_v42  ;;  %v637_v52 = vmul.f32 1.442695, %v565_v47  ;;  %v566_v53 = vmul.f32 5.0, %v479_v50  ;;  %v669_v62 = vmul.f32 1.442695, %v581_v48 }
 0x117   : > { %1360 = vpow2.f32 %v635_v46  ;;  %v481_v63 = vpop.f32.mrf.mxu0  ;;  %v582_v0 = vmul.f32 5.0, %v527_v51  ;;  %v529_v1 = vpop.f32.mrf.mxu1 }
 0x118   : > { %1362 = vpow2.f32 %v637_v52  ;;  %v639_v2 = vmul.f32 1.442695, %v566_v53  ;;  %v567_v3 = vmul.f32 5.0, %v481_v63  ;;  %v583_v4 = vmul.f32 5.0, %v529_v1 }
 0x119   : > { %1364 = vpow2.f32 %v667_v49  ;;  %v671_v5 = vmul.f32 1.442695, %v582_v0  ;;  %v485_v6 = vpop.f32.mrf.mxu0  ;;  %v533_v8 = vpop.f32.mrf.mxu1 }
 0x11a   : > { %1366 = vpow2.f32 %v669_v62  ;;  %v641_v9 = vmul.f32 1.442695, %v567_v3  ;;  %v568_v11 = vmul.f32 5.0, %v485_v6  ;;  %v673_v15 = vmul.f32 1.442695, %v583_v4 }
 0x11b   : > { %1368 = vpow2.f32 %v639_v2  ;;  %v487_v16 = vpop.f32.mrf.mxu0  ;;  %v584_v17 = vmul.f32 5.0, %v533_v8  ;;  %v535_v18 = vpop.f32.mrf.mxu1 }
 0x11c   : > { %1370 = vpow2.f32 %v641_v9  ;;  %v643_v20 = vmul.f32 1.442695, %v568_v11  ;;  %v569_v21 = vmul.f32 5.0, %v487_v16  ;;  %v585_v24 = vmul.f32 5.0, %v535_v18 }
 0x11d   : > { %1372 = vpow2.f32 %v671_v5  ;;  %v675_v25 = vmul.f32 1.442695, %v584_v17  ;;  %v491_v26 = vpop.f32.mrf.mxu0  ;;  %v539_v27 = vpop.f32.mrf.mxu1 }
 0x11e   : > { %1374 = vpow2.f32 %v673_v15  ;;  %v645_v28 = vmul.f32 1.442695, %v569_v21  ;;  %v570_v7 = vmul.f32 5.0, %v491_v26  ;;  %v677_v12 = vmul.f32 1.442695, %v585_v24 }
 0x11f   : > { %1376 = vpow2.f32 %v643_v20  ;;  %v493_v29 = vpop.f32.mrf.mxu0  ;;  %v586_v31 = vmul.f32 5.0, %v539_v27  ;;  %v541_v32 = vpop.f32.mrf.mxu1 }
 0x120   : > { %v1353_v33 = vpop.eup %1352  ;;  %1378 = vpow2.f32 %v645_v28  ;;  %v647_v34 = vmul.f32 1.442695, %v570_v7  ;;  %v571_v35 = vmul.f32 5.0, %v493_v29  ;;  %v587_v36 = vmul.f32 5.0, %v541_v32 }
 0x121   : > { %v1355_v37 = vpop.eup %1354  ;;  %1380 = vpow2.f32 %v675_v25  ;;  %v679_v38 = vmul.f32 1.442695, %v586_v31  ;;  %v497_v39 = vpop.f32.mrf.mxu0 }
 0x122   : > { %v545_v40 = vpop.f32.mrf.mxu1  ;;  %v1357_v41 = vpop.eup %1356  ;;  %1382 = vpow2.f32 %v677_v12  ;;  %v649_v42 = vmul.f32 1.442695, %v571_v35  ;;  %v572_v43 = vmul.f32 5.0, %v497_v39  ;;  %v681_v44 = vmul.f32 1.442695, %v587_v36 }
 0x123   : > { %v1359_v45 = vpop.eup %1358  ;;  %1384 = vpow2.f32 %v647_v34  ;;  %v499_v46 = vpop.f32.mrf.mxu0  ;;  %v588_v47 = vmul.f32 5.0, %v545_v40  ;;  %v695_v48 = vadd.f32 %v1355_v37, %v1353_v33 }
 0x124   : > { %v547_v49 = vpop.f32.mrf.mxu1  ;;  %v1361_v50 = vpop.eup %1360  ;;  %1386 = vpow2.f32 %v649_v42  ;;  %v651_v51 = vmul.f32 1.442695, %v572_v43  ;;  %v573_v52 = vmul.f32 5.0, %v499_v46  ;;  %v719_v11 = vadd.f32 %v1359_v45, %v1357_v41 }
 0x125   : > { %v589_v53 = vmul.f32 5.0, %v547_v49  ;;  %v1363_v62 = vpop.eup %1362  ;;  %1388 = vpow2.f32 %v679_v38  ;;  %v683_v63 = vmul.f32 1.442695, %v588_v47  ;;  %696 = vadd.xlane.f32.xlu0 %v695_v48  ;;  %v503_v0 = vpop.f32.mrf.mxu0 }
 0x126   : > { %v551_v1 = vpop.f32.mrf.mxu1  ;;  %v1365_v2 = vpop.eup %1364  ;;  %1390 = vpow2.f32 %v681_v44  ;;  %v653_v3 = vmul.f32 1.442695, %v573_v52  ;;  %v574_v4 = vmul.f32 5.0, %v503_v0  ;;  %v698_v15 = vadd.f32 %v1363_v62, %v1361_v50 }
 0x127   : > { %v685_v5 = vmul.f32 1.442695, %v589_v53  ;;  %v1367_v6 = vpop.eup %1366  ;;  %1392 = vpow2.f32 %v651_v51  ;;  %v505_v8 = vpop.f32.mrf.mxu0  ;;  %v590_v9 = vmul.f32 5.0, %v551_v1 }
 0x128   : > { %v553_v16 = vpop.f32.mrf.mxu1  ;;  %v1369_v17 = vpop.eup %1368  ;;  %1394 = vpow2.f32 %v653_v3  ;;  %v655_v18 = vmul.f32 1.442695, %v574_v4  ;;  %v575_v20 = vmul.f32 5.0, %v505_v8  ;;  %699 = vadd.xlane.f32.xlu1 %v698_v15  ;;  %v722_v34 = vadd.f32 %v1367_v6, %v1365_v2 }
 0x129   : > { %v591_v21 = vmul.f32 5.0, %v553_v16  ;;  %v1371_v24 = vpop.eup %1370  ;;  %1396 = vpow2.f32 %v683_v63  ;;  %v687_v25 = vmul.f32 1.442695, %v590_v9  ;;  %720 = vadd.xlane.f32.xlu0 %v719_v11  ;;  %v509_v26 = vpop.f32.mrf.mxu0 }
 0x12a   : > { %v557_v27 = vpop.f32.mrf.mxu1  ;;  %v1373_v28 = vpop.eup %1372  ;;  %1398 = vpow2.f32 %v685_v5  ;;  %v657_v7 = vmul.f32 1.442695, %v575_v20  ;;  %v576_v12 = vmul.f32 5.0, %v509_v26  ;;  %v701_v35 = vadd.f32 %v1371_v24, %v1369_v17 }
 0x12b   : > { %v689_v29 = vmul.f32 1.442695, %v591_v21  ;;  %v1375_v31 = vpop.eup %1374  ;;  %1400 = vpow2.f32 %v655_v18  ;;  %v511_v32 = vpop.f32.mrf.mxu0  ;;  %v592_v33 = vmul.f32 5.0, %v557_v27  ;;  %v932_v20 = vmul.f32 %v1873_v19, %v1610_v13 }
 0x12c   : > { %v559_v36 = vpop.f32.mrf.mxu1  ;;  %v1377_v37 = vpop.eup %1376  ;;  %1402 = vpow2.f32 %v657_v7  ;;  %v659_v38 = vmul.f32 1.442695, %v576_v12  ;;  %v577_v39 = vmul.f32 5.0, %v511_v32  ;;  %723 = vadd.xlane.f32.xlu1 %v722_v34  ;;  %v725_v48 = vadd.f32 %v1375_v31, %v1373_v28 }
 0x12d   : > { %v593_v40 = vmul.f32 5.0, %v559_v36  ;;  %v1379_v41 = vpop.eup %1378  ;;  %1404 = vpow2.f32 %v687_v25  ;;  %702 = vadd.xlane.f32.xlu0 %v701_v35  ;;  %v691_v44 = vmul.f32 1.442695, %v592_v33  ;;  %v952_v26 = vsel %vm256_vm0, %v932_v20, 0.0  ;;  %v623_v20 = vld [vmem:[#allocation2 + $0x40] sm:$0xff] }
 0x12e   : > { %v1381_v42 = vpop.eup %1380  ;;  %1406 = vpow2.f32 %v689_v29  ;;  %v661_v43 = vmul.f32 1.442695, %v577_v39  ;;  %v704_v45 = vadd.f32 %v1379_v41, %v1377_v37  ;;  %v934_v27 = vmul.f32 %v1873_v19, %v1634_v22 }
 0x12f   : > { %v1383_v46 = vpop.eup %1382  ;;  %1408 = vpow2.f32 %v659_v38  ;;  %v693_v47 = vmul.f32 1.442695, %v593_v40  ;;  %v933_v28 = vmul.f32 %v1873_v19, %v1613_v14  ;;  %v936_v29 = vmul.f32 %v1873_v19, %v1656_v30 }
 0x130   : > { %v1385_v49 = vpop.eup %1384  ;;  %1410 = vpow2.f32 %v661_v43  ;;  %705 = vadd.xlane.f32.xlu1 %v704_v45  ;;  %v728_v62 = vadd.f32 %v1383_v46, %v1381_v42  ;;  %v958_v12 = vsel %vm256_vm0, %v934_v27, 0.0  ;;  %v935_v31 = vmul.f32 %v1873_v19, %v1637_v23  ;;  %v797_v42 = vpop.xlane.xlu0 %796 }
 0x131   : > { %v1387_v50 = vpop.eup %1386  ;;  %726 = vadd.xlane.f32.xlu0 %v725_v48  ;;  %1412 = vpow2.f32 %v691_v44  ;;  %v955_v13 = vsel %vm256_vm0, %v933_v28, 0.0  ;;  %v964_v22 = vsel %vm256_vm0, %v936_v29, 0.0  ;;  %v938_v14 = vmul.f32 %v1873_v19, %v1598_v10  ;;  %v803_v43 = vpop.xlane.xlu1 %802 }
 0x132   : > { %v1389_v51 = vpop.eup %1388  ;;  %v707_v52 = vadd.f32 %v1387_v50, %v1385_v49  ;;  %1414 = vpow2.f32 %v693_v47  ;;  %v961_v32 = vsel %vm256_vm0, %v935_v31, 0.0  ;;  %v937_v33 = vmul.f32 %v1873_v19, %v1829_v60  ;;  %v624_v31 = vld [vmem:[#allocation2 + $0x48] sm:$0xff] }
 0x133   : > { %v1391_v53 = vpop.eup %1390  ;;  %v970_v34 = vsel %vm256_vm0, %v938_v14, 0.0  ;;  %v940_v23 = vmul.f32 %v1873_v19, %v1774_v55  ;;  %v939_v35 = vmul.f32 %v1873_v19, %v1763_v54  ;;  %v942_v60 = vmul.f32 %v1873_v19, %v1796_v57 }
 0x134   : > { %v1393_v63 = vpop.eup %1392  ;;  %729 = vadd.xlane.f32.xlu1 %v728_v62  ;;  %v731_v4 = vadd.f32 %v1391_v53, %v1389_v51  ;;  %v967_v30 = vsel %vm256_vm0, %v937_v33, 0.0  ;;  %v941_v37 = vmul.f32 %v1873_v19, %v1785_v56  ;;  %v944_v54 = vmul.f32 %v1873_v19, %v1818_v59  ;;  %v800_v59 = vpop.xlane.xlu0 %799 }
 0x135   : > { %v1395_v0 = vpop.eup %1394  ;;  %708 = vadd.xlane.f32.xlu0 %v707_v52  ;;  %v976_v36 = vsel %vm256_vm0, %v940_v23, 0.0  ;;  %v973_v10 = vsel %vm256_vm0, %v939_v35, 0.0  ;;  %v982_v38 = vsel %vm256_vm0, %v942_v60, 0.0  ;;  %v943_v39 = vmul.f32 %v1873_v19, %v1807_v58  ;;  %v806_v44 = vpop.xlane.xlu1 %805 }
 0x136   : > { %v1397_v1 = vpop.eup %1396  ;;  %v710_v2 = vadd.f32 %v1395_v0, %v1393_v63  ;;  %v979_v55 = vsel %vm256_vm0, %v941_v37, 0.0  ;;  %v988_v40 = vsel %vm256_vm0, %v944_v54, 0.0  ;;  %v945_v56 = vmul.f32 %v1873_v19, %v1832_v61  ;;  %v625_v37 = vld [vmem:[#allocation2 + $0x50] sm:$0xff] }
 0x137   : > { %v1399_v3 = vpop.eup %1398  ;;  %v985_v57 = vsel %vm256_vm0, %v943_v39, 0.0  ;;  %v843_v53 = vmul.f32 5.0, %v797_v42  ;;  %v844_v0 = vmul.f32 5.0, %v800_v59 }
 0x138   : > { %v1401_v5 = vpop.eup %1400  ;;  %711 = vadd.xlane.f32.xlu1 %v710_v2  ;;  %v734_v15 = vadd.f32 %v1399_v3, %v1397_v1  ;;  %v991_v41 = vsel %vm256_vm0, %v945_v56, 0.0  ;;  %v809_v45 = vpop.xlane.xlu0 %808  ;;  %v845_v2 = vmul.f32 5.0, %v803_v43 }
 0x139   : > { %v1403_v6 = vpop.eup %1402  ;;  %732 = vadd.xlane.f32.xlu0 %v731_v4  ;;  %v812_v58 = vpop.xlane.xlu1 %811  ;;  %v875_v63 = vmul.f32 1.442695, %v843_v53  ;;  %v877_v3 = vmul.f32 1.442695, %v844_v0 }
 0x13a   : > { %v1405_v8 = vpop.eup %1404  ;;  %v713_v9 = vadd.f32 %v1403_v6, %v1401_v5  ;;  %v615_v6 = vld [vmem:[#allocation2] sm:$0xff] }
 0x13b   : > { %v1407_v11 = vpop.eup %1406  ;;  %1416 = vpow2.f32 %v875_v63 }
 0x13c   : > { %v1409_v16 = vpop.eup %1408  ;;  %735 = vadd.xlane.f32.xlu1 %v734_v15  ;;  %v737_v24 = vadd.f32 %v1407_v11, %v1405_v8  ;;  %v815_v46 = vpop.xlane.xlu0 %814  ;;  %v846_v8 = vmul.f32 5.0, %v806_v44  ;;  %v879_v11 = vmul.f32 1.442695, %v845_v2  ;;  %1418 = vpow2.f32 %v877_v3 }
 0x13d   : > { %v1411_v17 = vpop.eup %1410  ;;  %714 = vadd.xlane.f32.xlu0 %v713_v9  ;;  %v1942_v47 = vpop.xlane.xlu1 %817  ;;  %v849_v54 = vmul.f32 5.0, %v815_v46  ;;  %v619_v46 = vld [vmem:[#allocation2 + $0x20] sm:$0xff] }
 0x13e   : > { %v716_v18 = vadd.f32 %v1411_v17, %v1409_v16  ;;  %v1413_v21 = vpop.eup %1412  ;;  %1420 = vpow2.f32 %v879_v11  ;;  %v850_v44 = vmul.f32 5.0, %v1942_v47 }
 0x13f   : > { %v1415_v25 = vpop.eup %1414 }
 0x140   : > { %717 = vadd.xlane.f32.xlu1 %v716_v18  ;;  %v740_v7 = vadd.f32 %v1415_v25, %v1413_v21  ;;  %v821_v48 = vpop.xlane.xlu0 %820  ;;  %v616_v21 = vld [vmem:[#allocation2 + $0x8] sm:$0xff]  ;;  %v847_v25 = vmul.f32 5.0, %v809_v45  ;;  %v889_v2 = vmul.f32 1.442695, %v850_v44  ;;  %v630_v44 = vld [vmem:[#allocation2 + $0x78] sm:$0xff] }
 0x141   : > { %738 = vadd.xlane.f32.xlu0 %v737_v24  ;;  %v824_v49 = vpop.xlane.xlu1 %823  ;;  %v851_v4 = vmul.f32 5.0, %v821_v48  ;;  %v881_v24 = vmul.f32 1.442695, %v846_v8  ;;  %v887_v48 = vmul.f32 1.442695, %v849_v54 }
 0x142   : > { %v852_v15 = vmul.f32 5.0, %v824_v49  ;;  %v883_v14 = vmul.f32 1.442695, %v847_v25 }
 0x143   : > { %v891_v17 = vmul.f32 1.442695, %v851_v4  ;;  %v627_v4 = vld [vmem:[#allocation2 + $0x60] sm:$0xff] }
 0x144   : > { %741 = vadd.xlane.f32.xlu1 %v740_v7  ;;  %v827_v50 = vpop.xlane.xlu0 %826  ;;  %v893_v28 = vmul.f32 1.442695, %v852_v15 }
 0x145   : > { %953 = vadd.xlane.f32.xlu0 %v952_v26  ;;  %v830_v51 = vpop.xlane.xlu1 %829  ;;  %v853_v18 = vmul.f32 5.0, %v827_v50  ;;  %1422 = vpow2.f32 %v891_v17 }
 0x146   : > { %v854_v29 = vmul.f32 5.0, %v830_v51  ;;  %1424 = vpow2.f32 %v881_v24 }
 0x147   : > { %1426 = vpow2.f32 %v893_v28 }
 0x148   : > { %956 = vadd.xlane.f32.xlu1 %v955_v13  ;;  %v833_v52 = vpop.xlane.xlu0 %832  ;;  %v895_v13 = vmul.f32 1.442695, %v853_v18 }
 0x149   : > { %959 = vadd.xlane.f32.xlu0 %v958_v12  ;;  %v836_v61 = vpop.xlane.xlu1 %835  ;;  %v855_v33 = vmul.f32 5.0, %v833_v52 }
 0x14a   : > { %1428 = vpow2.f32 %v895_v13 }
 0x14b   : > { %1430 = vpow2.f32 %v883_v14 }
 0x14c   : > { %962 = vadd.xlane.f32.xlu1 %v961_v32  ;;  %v1944_v19 = vpop.xlane.xlu0 %838  ;;  %v848_v32 = vmul.f32 5.0, %v812_v58  ;;  %v626_v58 = vld [vmem:[#allocation2 + $0x58] sm:$0xff] }
 0x14d   : > { %965 = vadd.xlane.f32.xlu0 %v964_v22  ;;  %v1946_v62 = vpop.xlane.xlu1 %841  ;;  %v617_v22 = vld [vmem:[#allocation2 + $0x10] sm:$0xff]  ;;  %v857_v49 = vmul.f32 5.0, %v1944_v19 }
 0x14e   : > { %v858_v3 = vmul.f32 5.0, %v1946_v62  ;;  %v628_v62 = vld [vmem:[#allocation2 + $0x68] sm:$0xff] }
 0x150   : > { %968 = vadd.xlane.f32.xlu1 %v967_v30  ;;  %v1948_v1 = vpop.xlane.xlu0 %947 }
 0x151   : > { %971 = vadd.xlane.f32.xlu0 %v970_v34  ;;  %v1950_v5 = vpop.xlane.xlu1 %950  ;;  %v994_v54 = vmul.f32 5.0, %v1948_v1 }
 0x154   : > { %974 = vadd.xlane.f32.xlu1 %v973_v10  ;;  %v897_v10 = vmul.f32 1.442695, %v854_v29 }
 0x155   : > { %977 = vadd.xlane.f32.xlu0 %v976_v36  ;;  %v1417_v36 = vpop.eup %1416 }
 0x156   : > { %v1419_v59 = vpop.eup %1418 }
 0x157   : > { %v1421_v0 = vpop.eup %1420 }
 0x158   : > { %980 = vadd.xlane.f32.xlu1 %v979_v55  ;;  %v885_v55 = vmul.f32 1.442695, %v848_v32  ;;  %v1423_v8 = vpop.eup %1422 }
 0x159   : > { %983 = vadd.xlane.f32.xlu0 %v982_v38  ;;  %v618_v38 = vld [vmem:[#allocation2 + $0x18] sm:$0xff] }
 0x15c   : > { %986 = vadd.xlane.f32.xlu1 %v985_v57  ;;  %v856_v57 = vmul.f32 5.0, %v836_v61 }
 0x15d   : > { %989 = vadd.xlane.f32.xlu0 %v988_v40  ;;  %v899_v40 = vmul.f32 1.442695, %v855_v33 }
 0x15e   : > { %v901_v51 = vmul.f32 1.442695, %v856_v57 }
 0x160   : > { %992 = vadd.xlane.f32.xlu1 %v991_v41 }
 0x1ae   : > { %v697_v9 = vpop.xlane.xlu0 %696 }
 0x1af   : > { %v743_v16 = vadd.f32 %v697_v9, %v615_v6  ;;  %v620_v6 = vld [vmem:[#allocation2 + $0x28] sm:$0xff]  ;;  %v903_v9 = vmul.f32 1.442695, %v857_v49 }
 0x1b1   : > { %760 = vst.msk [vmem:[#allocation2] sm:$0xff] %vm598_vm1, %v743_v16  ;;  %v700_v27 = vpop.xlane.xlu1 %699 }
 0x1b2   : > { %v721_v26 = vpop.xlane.xlu0 %720  ;;  %v744_v12 = vadd.f32 %v700_v27, %v616_v21  ;;  %v621_v27 = vld [vmem:[#allocation2 + $0x30] sm:$0xff] }
 0x1b3   : > { %v751_v7 = vadd.f32 %v721_v26, %v623_v20  ;;  %v1425_v20 = vpop.eup %1424  ;;  %v905_v26 = vmul.f32 1.442695, %v858_v3 }
 0x1b4   : > { %761 = vst.msk [vmem:[#allocation2 + $0x8] sm:$0xff] %vm598_vm1, %v744_v12  ;;  %v1427_v25 = vpop.eup %1426 }
 0x1b5   : > { %768 = vst.msk [vmem:[#allocation2 + $0x40] sm:$0xff] %vm598_vm1, %v751_v7  ;;  %v724_v34 = vpop.xlane.xlu1 %723  ;;  %v1429_v12 = vpop.eup %1428 }
 0x1b6   : > { %v703_v30 = vpop.xlane.xlu0 %702  ;;  %v752_v23 = vadd.f32 %v724_v34, %v624_v31  ;;  %v1431_v14 = vpop.eup %1430 }
 0x1b7   : > { %v745_v35 = vadd.f32 %v703_v30, %v617_v22  ;;  %v629_v30 = vld [vmem:[#allocation2 + $0x70] sm:$0xff] }
 0x1b8   : > { %v859_v60 = vld [vmem:[#allocation2] sm:$0xff]  ;;  %769 = vst.msk [vmem:[#allocation2 + $0x48] sm:$0xff] %vm598_vm1, %v752_v23 }
 0x1b9   : > { %v907_v39 = vsub.f32 %v859_v60, %v1417_v36  ;;  %762 = vst.msk [vmem:[#allocation2 + $0x10] sm:$0xff] %vm598_vm1, %v745_v35  ;;  %v706_v41 = vpop.xlane.xlu1 %705  ;;  %v622_v35 = vld [vmem:[#allocation2 + $0x38] sm:$0xff] }
 0x1ba   : > { %v727_v56 = vpop.xlane.xlu0 %726  ;;  %v746_v43 = vadd.f32 %v706_v41, %v618_v38 }
 0x1bb   : > { %1432 = vlog2.f32 %v907_v39  ;;  %v753_v42 = vadd.f32 %v727_v56, %v625_v37  ;;  %v860_v45 = vld [vmem:[#allocation2 + $0x8] sm:$0xff] }
 0x1bc   : > { %1434 = vpow2.f32 %v897_v10  ;;  %v908_v50 = vsub.f32 %v860_v45, %v1419_v59  ;;  %763 = vst.msk [vmem:[#allocation2 + $0x18] sm:$0xff] %vm598_vm1, %v746_v43  ;;  %v867_v63 = vld [vmem:[#allocation2 + $0x40] sm:$0xff] }
 0x1bd   : > { %1436 = vpow2.f32 %v885_v55  ;;  %770 = vst.msk [vmem:[#allocation2 + $0x50] sm:$0xff] %vm598_vm1, %v753_v42  ;;  %v730_v52 = vpop.xlane.xlu1 %729  ;;  %v915_v17 = vsub.f32 %v867_v63, %v1423_v8 }
 0x1be   : > { %1438 = vpow2.f32 %v899_v40  ;;  %v709_v61 = vpop.xlane.xlu0 %708  ;;  %v754_v53 = vadd.f32 %v730_v52, %v626_v58 }
 0x1bf   : > { %1440 = vlog2.f32 %v908_v50  ;;  %v747_v47 = vadd.f32 %v709_v61, %v619_v46  ;;  %v868_v18 = vld [vmem:[#allocation2 + $0x48] sm:$0xff] }
 0x1c0   : > { %v861_v19 = vld [vmem:[#allocation2 + $0x10] sm:$0xff]  ;;  %1442 = vpow2.f32 %v887_v48  ;;  %771 = vst.msk [vmem:[#allocation2 + $0x58] sm:$0xff] %vm598_vm1, %v754_v53  ;;  %v916_v29 = vsub.f32 %v868_v18, %v1427_v25  ;;  %v995_v53 = vmul.f32 5.0, %v1950_v5 }
 0x1c1   : > { %764 = vst.msk [vmem:[#allocation2 + $0x20] sm:$0xff] %vm598_vm1, %v747_v47  ;;  %v909_v11 = vsub.f32 %v861_v19, %v1421_v0  ;;  %1444 = vpow2.f32 %v901_v51  ;;  %v712_v16 = vpop.xlane.xlu1 %711 }
 0x1c2   : > { %v733_v15 = vpop.xlane.xlu0 %732  ;;  %v748_v24 = vadd.f32 %v712_v16, %v620_v6 }
 0x1c3   : > { %v755_v21 = vadd.f32 %v733_v15, %v627_v4  ;;  %1446 = vlog2.f32 %v909_v11  ;;  %v862_v28 = vld [vmem:[#allocation2 + $0x18] sm:$0xff] }
 0x1c4   : > { %1448 = vpow2.f32 %v889_v2  ;;  %v869_v7 = vld [vmem:[#allocation2 + $0x50] sm:$0xff]  ;;  %765 = vst.msk [vmem:[#allocation2 + $0x28] sm:$0xff] %vm598_vm1, %v748_v24  ;;  %v910_v13 = vsub.f32 %v862_v28, %v1425_v20 }
 0x1c5   : > { %1450 = vpow2.f32 %v903_v9  ;;  %772 = vst.msk [vmem:[#allocation2 + $0x60] sm:$0xff] %vm598_vm1, %v755_v21  ;;  %v736_v31 = vpop.xlane.xlu1 %735  ;;  %v917_v32 = vsub.f32 %v869_v7, %v1429_v12 }
 0x1c6   : > { %v715_v22 = vpop.xlane.xlu0 %714  ;;  %1452 = vlog2.f32 %v915_v17  ;;  %v756_v33 = vadd.f32 %v736_v31, %v628_v62 }
 0x1c7   : > { %v749_v34 = vadd.f32 %v715_v22, %v621_v27  ;;  %1454 = vlog2.f32 %v910_v13  ;;  %v870_v10 = vld [vmem:[#allocation2 + $0x58] sm:$0xff] }
 0x1c8   : > { %v1433_v23 = vpop.eup %1432  ;;  %1456 = vpow2.f32 %v905_v26  ;;  %v863_v36 = vld [vmem:[#allocation2 + $0x20] sm:$0xff]  ;;  %773 = vst.msk [vmem:[#allocation2 + $0x68] sm:$0xff] %vm598_vm1, %v756_v33 }
 0x1c9   : > { %v1435_v60 = vpop.eup %1434  ;;  %v1011_v37 = vmul.f32 0.6931472, %v1433_v23  ;;  %766 = vst.msk [vmem:[#allocation2 + $0x30] sm:$0xff] %vm598_vm1, %v749_v34  ;;  %v911_v38 = vsub.f32 %v863_v36, %v1431_v14  ;;  %1458 = vlog2.f32 %v916_v29  ;;  %v718_v40 = vpop.xlane.xlu1 %717 }
 0x1ca   : > { %v1437_v55 = vpop.eup %1436  ;;  %v739_v39 = vpop.xlane.xlu0 %738  ;;  %1460 = vlog2.f32 %v917_v32  ;;  %v918_v57 = vsub.f32 %v870_v10, %v1435_v60  ;;  %v750_v43 = vadd.f32 %v718_v40, %v622_v35 }
 0x1cb   : > { %v1439_v56 = vpop.eup %1438  ;;  %v1042_v41 = vmul.f32 256.0, %v1011_v37  ;;  %v757_v42 = vadd.f32 %v739_v39, %v629_v30  ;;  %1462 = vlog2.f32 %v911_v38  ;;  %v864_v45 = vld [vmem:[#allocation2 + $0x28] sm:$0xff] }
 0x1cc   : > { %v1441_v59 = vpop.eup %1440  ;;  %v871_v1 = vld [vmem:[#allocation2 + $0x60] sm:$0xff]  ;;  %767 = vst.msk [vmem:[#allocation2 + $0x38] sm:$0xff] %vm598_vm1, %v750_v43  ;;  %v912_v48 = vsub.f32 %v864_v45, %v1437_v55  ;;  %1464 = vlog2.f32 %v918_v57 }
 0x1cd   : > { %v1058_v58 = vsub.f32 %v1042_v41, %v994_v54  ;;  %v1013_v46 = vmul.f32 0.6931472, %v1441_v59  ;;  %774 = vst.msk [vmem:[#allocation2 + $0x70] sm:$0xff] %vm598_vm1, %v757_v42  ;;  %v919_v49 = vsub.f32 %v871_v1, %v1439_v56  ;;  %v1443_v50 = vpop.eup %1442  ;;  %v742_v52 = vpop.xlane.xlu1 %741 }
 0x1ce   : > { %v954_v51 = vpop.xlane.xlu0 %953  ;;  %v1445_v61 = vpop.eup %1444  ;;  %v758_v63 = vadd.f32 %v742_v52, %v630_v44  ;;  %1466 = vlog2.f32 %v912_v48 }
 0x1cf   : > { %1074 = vst.msk [vmem:[%s1974_s23] sm:$0xff] %vm598_vm1, %v1058_v58  ;;  %v1043_v47 = vmul.f32 256.0, %v1013_v46  ;;  %v996_v2 = vmul.f32 5.0, %v954_v51  ;;  %1468 = vlog2.f32 %v919_v49  ;;  %v872_v4 = vld [vmem:[#allocation2 + $0x68] sm:$0xff] }
 0x1d0   : > { %v1447_v0 = vpop.eup %1446  ;;  %v865_v3 = vld [vmem:[#allocation2 + $0x30] sm:$0xff]  ;;  %775 = vst.msk [vmem:[#allocation2 + $0x78] sm:$0xff] %vm598_vm1, %v758_v63  ;;  %v920_v11 = vsub.f32 %v872_v4, %v1445_v61 }
 0x1d1   : > { %v1449_v6 = vpop.eup %1448  ;;  %v1059_v19 = vsub.f32 %v1043_v47, %v995_v53  ;;  %v1015_v8 = vmul.f32 0.6931472, %v1447_v0  ;;  %v913_v9 = vsub.f32 %v865_v3, %v1443_v50  ;;  %v957_v16 = vpop.xlane.xlu1 %956 }
 0x1d2   : > { %v1451_v15 = vpop.eup %1450  ;;  %v960_v5 = vpop.xlane.xlu0 %959  ;;  %v997_v32 = vmul.f32 5.0, %v957_v16 }
 0x1d3   : > { %v1453_v17 = vpop.eup %1452  ;;  %1075 = vst.msk [vmem:[%s1974_s23 + $0x8] sm:$0xff] %vm598_vm1, %v1059_v19  ;;  %v1044_v18 = vmul.f32 256.0, %v1015_v8  ;;  %1470 = vlog2.f32 %v913_v9  ;;  %v866_v21 = vld [vmem:[#allocation2 + $0x38] sm:$0xff]  ;;  %v998_v35 = vmul.f32 5.0, %v960_v5 }
 0x1d4   : > { %v1455_v20 = vpop.eup %1454  ;;  %v873_v24 = vld [vmem:[#allocation2 + $0x70] sm:$0xff]  ;;  %1472 = vlog2.f32 %v920_v11  ;;  %v914_v27 = vsub.f32 %v866_v21, %v1449_v6  ;;  %v1027_v29 = vmul.f32 0.6931472, %v1453_v17 }
 0x1d5   : > { %v1457_v62 = vpop.eup %1456  ;;  %v1060_v25 = vsub.f32 %v1044_v18, %v996_v2  ;;  %v1017_v26 = vmul.f32 0.6931472, %v1455_v20  ;;  %v921_v28 = vsub.f32 %v873_v24, %v1451_v15  ;;  %v963_v13 = vpop.xlane.xlu1 %962 }
 0x1d6   : > { %v1459_v7 = vpop.eup %1458  ;;  %v966_v12 = vpop.xlane.xlu0 %965  ;;  %1474 = vlog2.f32 %v914_v27  ;;  %v1050_v36 = vmul.f32 256.0, %v1027_v29  ;;  %v999_v43 = vmul.f32 5.0, %v963_v13 }
 0x1d7   : > { %v1461_v31 = vpop.eup %1460  ;;  %1076 = vst.msk [vmem:[%s1974_s23 + $0x10] sm:$0xff] %vm598_vm1, %v1060_v25  ;;  %v1045_v22 = vmul.f32 256.0, %v1017_v26  ;;  %1476 = vlog2.f32 %v921_v28  ;;  %v874_v33 = vld [vmem:[#allocation2 + $0x78] sm:$0xff]  ;;  %v1029_v37 = vmul.f32 0.6931472, %v1459_v7  ;;  %v1000_v0 = vmul.f32 5.0, %v966_v12 }
 0x1d8   : > { %v1463_v14 = vpop.eup %1462  ;;  %v922_v23 = vsub.f32 %v874_v33, %v1457_v62  ;;  %v1031_v39 = vmul.f32 0.6931472, %v1461_v31 }
 0x1d9   : > { %v1019_v34 = vmul.f32 0.6931472, %v1463_v14  ;;  %v1061_v30 = vsub.f32 %v1045_v22, %v997_v32  ;;  %v969_v60 = vpop.xlane.xlu1 %968  ;;  %v1465_v38 = vpop.eup %1464  ;;  %v1051_v44 = vmul.f32 256.0, %v1029_v37 }
 0x1da   : > { %v972_v10 = vpop.xlane.xlu0 %971  ;;  %1478 = vlog2.f32 %v922_v23  ;;  %v1033_v58 = vmul.f32 0.6931472, %v1465_v38  ;;  %v1052_v48 = vmul.f32 256.0, %v1031_v39  ;;  %v1001_v21 = vmul.f32 5.0, %v969_v60 }
 0x1db   : > { %v1046_v55 = vmul.f32 256.0, %v1019_v34  ;;  %1077 = vst.msk [vmem:[%s1974_s23 + $0x18] sm:$0xff] %vm598_vm1, %v1061_v30  ;;  %v1002_v54 = vmul.f32 5.0, %v972_v10  ;;  %v1467_v40 = vpop.eup %1466 }
 0x1dc   : > { %v1469_v57 = vpop.eup %1468  ;;  %v1021_v41 = vmul.f32 0.6931472, %v1467_v40  ;;  %v1053_v4 = vmul.f32 256.0, %v1033_v58 }
 0x1dd   : > { %v1062_v56 = vsub.f32 %v1046_v55, %v998_v35  ;;  %v1066_v42 = vsub.f32 %v1050_v36, %v1002_v54  ;;  %v975_v45 = vpop.xlane.xlu1 %974  ;;  %v1035_v1 = vmul.f32 0.6931472, %v1469_v57 }
 0x1de   : > { %v978_v59 = vpop.xlane.xlu0 %977  ;;  %v1047_v46 = vmul.f32 256.0, %v1021_v41  ;;  %v1003_v50 = vmul.f32 5.0, %v975_v45 }
 0x1df   : > { %1078 = vst.msk [vmem:[%s1974_s23 + $0x20] sm:$0xff] %vm598_vm1, %v1062_v56  ;;  %1082 = vst.msk [vmem:[%s1974_s23 + $0x40] sm:$0xff] %vm598_vm1, %v1066_v42  ;;  %v1004_v49 = vmul.f32 5.0, %v978_v59  ;;  %v1054_v2 = vmul.f32 256.0, %v1035_v1 }
 0x1e0   : > { %v1471_v51 = vpop.eup %1470  ;;  %v1063_v53 = vsub.f32 %v1047_v46, %v999_v43  ;;  %v1067_v63 = vsub.f32 %v1051_v44, %v1003_v50 }
 0x1e1   : > { %v1473_v52 = vpop.eup %1472  ;;  %v1023_v61 = vmul.f32 0.6931472, %v1471_v51  ;;  %v1068_v47 = vsub.f32 %v1052_v48, %v1004_v49  ;;  %v981_v6 = vpop.xlane.xlu1 %980 }
 0x1e2   : > { %v984_v3 = vpop.xlane.xlu0 %983  ;;  %1079 = vst.msk [vmem:[%s1974_s23 + $0x28] sm:$0xff] %vm598_vm1, %v1063_v53  ;;  %1083 = vst.msk [vmem:[%s1974_s23 + $0x48] sm:$0xff] %vm598_vm1, %v1067_v63  ;;  %v1005_v9 = vmul.f32 5.0, %v981_v6  ;;  %v1037_v11 = vmul.f32 0.6931472, %v1473_v52 }
 0x1e3   : > { %v1048_v19 = vmul.f32 256.0, %v1023_v61  ;;  %1084 = vst.msk [vmem:[%s1974_s23 + $0x50] sm:$0xff] %vm598_vm1, %v1068_v47  ;;  %v1006_v8 = vmul.f32 5.0, %v984_v3  ;;  %v1475_v15 = vpop.eup %1474 }
 0x1e4   : > { %v1477_v5 = vpop.eup %1476  ;;  %v1025_v17 = vmul.f32 0.6931472, %v1475_v15  ;;  %v1069_v20 = vsub.f32 %v1053_v4, %v1005_v9  ;;  %v1055_v28 = vmul.f32 256.0, %v1037_v11 }
 0x1e5   : > { %v1064_v16 = vsub.f32 %v1048_v19, %v1000_v0  ;;  %v1070_v18 = vsub.f32 %v1054_v2, %v1006_v8  ;;  %v1039_v24 = vmul.f32 0.6931472, %v1477_v5  ;;  %v987_v25 = vpop.xlane.xlu1 %986 }
 0x1e6   : > { %v990_v62 = vpop.xlane.xlu0 %989  ;;  %v1049_v26 = vmul.f32 256.0, %v1025_v17  ;;  %1085 = vst.msk [vmem:[%s1974_s23 + $0x58] sm:$0xff] %vm598_vm1, %v1069_v20  ;;  %v1007_v7 = vmul.f32 5.0, %v987_v25 }
 0x1e7   : > { %1080 = vst.msk [vmem:[%s1974_s23 + $0x30] sm:$0xff] %vm598_vm1, %v1064_v16  ;;  %1086 = vst.msk [vmem:[%s1974_s23 + $0x60] sm:$0xff] %vm598_vm1, %v1070_v18  ;;  %v1008_v27 = vmul.f32 5.0, %v990_v62  ;;  %v1479_v12 = vpop.eup %1478  ;;  %v1056_v13 = vmul.f32 256.0, %v1039_v24 }
 0x1e8   : > { %v1065_v29 = vsub.f32 %v1049_v26, %v1001_v21  ;;  %v1071_v31 = vsub.f32 %v1055_v28, %v1007_v7  ;;  %v1041_v22 = vmul.f32 0.6931472, %v1479_v12 }
 0x1e9   : > { %v1072_v32 = vsub.f32 %v1056_v13, %v1008_v27  ;;  %v993_v14 = vpop.xlane.xlu1 %992 }
 0x1ea   : > { %1081 = vst.msk [vmem:[%s1974_s23 + $0x38] sm:$0xff] %vm598_vm1, %v1065_v29  ;;  %1087 = vst.msk [vmem:[%s1974_s23 + $0x68] sm:$0xff] %vm598_vm1, %v1071_v31  ;;  %v1057_v33 = vmul.f32 256.0, %v1041_v22  ;;  %v1009_v34 = vmul.f32 5.0, %v993_v14 }
 0x1eb   : > { %1088 = vst.msk [vmem:[%s1974_s23 + $0x70] sm:$0xff] %vm598_vm1, %v1072_v32 }
 0x1ec   : > { %v1073_v30 = vsub.f32 %v1057_v33, %v1009_v34 }
 0x1ee   : > { %1089 = vst.msk [vmem:[%s1974_s23 + $0x78] sm:$0xff] %vm598_vm1, %v1073_v30 }
 0x1ef PF: > { %s13_s14 = sadd.s32 1, %s1502_s14   ;;  %s2025_s12 = smov %s1498_s13 }
 0x1f0   : > { %p10_p5 = scmp.ge.s32.totalorder %s13_s14, 4   ;;  %s2026_s13 = smov %s2028_s15 }
 0x1f2   :  { %12 = sbr.rel (!%p10_p5) target bundleno = 2 (0x2), region = 73 }

</bundles_post_ra>
